<compile_context>
chip_gen: v5e
topology: v5e:2x2
jax: 0.10.0
libtpu: 0.0.40
codegen_flags: <defaults>
</compile_context>

<pallas_src>
import functools

import jax
import jax.numpy as jnp
from jax import lax
from jax.experimental import pallas as pl
from jax.experimental.pallas import tpu as pltpu


# ----------------------------------------------------------------------------
# Fused kernel: QKV projection + causal attention (all heads) + output proj.
# ----------------------------------------------------------------------------
def _mha_kernel(
    x_ref,      # (1, T, C)   input activations for batch b (constant over qi)
    wq_ref,     # (C, C)      fused per-head query weights (heads along lanes)
    wk_ref,     # (C, C)      fused per-head key weights
    wv_ref,     # (C, C)      fused per-head value weights
    wp_ref,     # (C, C)      output projection weight (in -> out)
    bp_ref,     # (1, C)      output projection bias
    o_ref,      # (1, tq, C)  output tile
    k_vmem,     # (T, C) f32  scratch: cached K for this batch element
    v_vmem,     # (T, C) f32  scratch: cached V
    *,
    tq,
    n_heads,
    head_size,
    n_embd,
):
    qi = pl.program_id(1)

    # K / V projections over the full sequence, computed once per batch element
    # and reused by every query tile (qi axis is "arbitrary" => sequential).
    @pl.when(qi == 0)
    def _():
        x_full = x_ref[0]  # (T, C)
        k_vmem[...] = jnp.dot(x_full, wk_ref[...], preferred_element_type=jnp.float32)
        v_vmem[...] = jnp.dot(x_full, wv_ref[...], preferred_element_type=jnp.float32)

    # Query rows for this tile.
    q_start = pl.multiple_of(qi * tq, tq)
    x_q = x_ref[0, pl.ds(q_start, tq), :]                                   # (tq, C)
    q = jnp.dot(x_q, wq_ref[...], preferred_element_type=jnp.float32)       # (tq, C)
    k = k_vmem[...]                                                         # (T, C)
    v = v_vmem[...]                                                         # (T, C)
    T = k.shape[0]

    # NB: reference scales by n_embd**-0.5 (C, not head_size) -- reproduced exactly.
    scale = jnp.float32(float(n_embd) ** -0.5)

    # Causal mask for this query tile only (shrunk to (tq, T)).
    row = qi * tq + lax.broadcasted_iota(jnp.int32, (tq, T), 0)
    col = lax.broadcasted_iota(jnp.int32, (tq, T), 1)
    causal = row >= col

    # Per-head attention; head slices are static column slices of the fused
    # lane-dense q/k/v tiles.  Scores use dot_general contracting on the last
    # dims so k is never explicitly transposed.
    # NOTE: for bf16 inputs, cast the dot operands to bf16 (accumulate f32 via
    # preferred_element_type) to hit the full-rate MXU path on v5e/v6e/v7x.
    head_outs = []
    for h in range(n_heads):
        lo = h * head_size
        hi = lo + head_size
        q_h = q[:, lo:hi]                                                   # (tq, H)
        k_h = k[:, lo:hi]                                                   # (T,  H)
        v_h = v[:, lo:hi]                                                   # (T,  H)

        s = lax.dot_general(
            q_h, k_h, (((1,), (1,)), ((), ())),
            preferred_element_type=jnp.float32,
        ) * scale                                                           # (tq, T)
        s = jnp.where(causal, s, -jnp.inf)
        s = s - jnp.max(s, axis=-1, keepdims=True)
        p = jnp.exp(s)
        # EUP approximate reciprocal instead of a VPU divide.
        p = p * pl.reciprocal(jnp.sum(p, axis=-1, keepdims=True), approx=True)
        # TODO(synk): dropout on attention probs omitted (identity in eval mode).
        head_outs.append(jnp.dot(p, v_h, preferred_element_type=jnp.float32))

    attn = jnp.concatenate(head_outs, axis=-1)                              # (tq, C)

    # Fused output projection + bias (w_proj kept resident in VMEM).
    y = jnp.dot(attn, wp_ref[...], preferred_element_type=jnp.float32) + bp_ref[...]
    # TODO(synk): output dropout omitted (identity in eval mode).
    o_ref[0] = y.astype(o_ref.dtype)


def multi_heads_forward(x, params):
    """x: (B, T, C); params: wq/wk/wv (n_heads, C, H), w_proj (C, C), b_proj (1, C)."""
    B, T, C = x.shape
    n_heads, _, H = params["wq"].shape
    assert n_heads * H == C, "module requires n_embd == n_heads * head_size"

    # Fuse per-head weights along the output (lane) axis: (n_heads, C, H) ->
    # (C, n_heads*H), columns [h*H:(h+1)*H] == head h (matches torch.cat order).
    def fuse(w):
        return jnp.transpose(w, (1, 0, 2)).reshape(C, n_heads * H)

    wq = fuse(params["wq"])
    wk = fuse(params["wk"])
    wv = fuse(params["wv"])
    w_proj = params["w_proj"]
    b_proj = params["b_proj"]

    # Query-tile size: keep VMEM flat for long sequences, degenerate to full T
    # for short ones (must divide T and be 8-aligned or equal to T).
    tq = 256 if (T % 256 == 0) else T
    n_q = T // tq

    kernel = functools.partial(
        _mha_kernel, tq=tq, n_heads=n_heads, head_size=H, n_embd=C
    )

    out = pl.pallas_call(
        kernel,
        out_shape=jax.ShapeDtypeStruct((B, T, C), x.dtype),
        grid_spec=pltpu.PrefetchScalarGridSpec(
            num_scalar_prefetch=0,
            grid=(B, n_q),
            in_specs=[
                pl.BlockSpec((1, T, C), lambda b, qi: (b, 0, 0)),   # x (not re-DMA'd over qi)
                pl.BlockSpec((C, C), lambda b, qi: (0, 0)),         # wq fused
                pl.BlockSpec((C, C), lambda b, qi: (0, 0)),         # wk fused
                pl.BlockSpec((C, C), lambda b, qi: (0, 0)),         # wv fused
                pl.BlockSpec((C, C), lambda b, qi: (0, 0)),         # w_proj
                pl.BlockSpec((1, C), lambda b, qi: (0, 0)),         # b_proj
            ],
            out_specs=pl.BlockSpec((1, tq, C), lambda b, qi: (b, qi, 0)),
            scratch_shapes=[
                pltpu.VMEM((T, C), jnp.float32),   # cached K
                pltpu.VMEM((T, C), jnp.float32),   # cached V
            ],
        ),
        compiler_params=pltpu.CompilerParams(
            dimension_semantics=("parallel", "arbitrary"),
        ),
    )(x, wq, wk, wv, w_proj, b_proj)
    return out


# ----------------------------------------------------------------------------
# Pure-JAX reference (mirrors the PyTorch module, eval mode)
# ----------------------------------------------------------------------------
def reference_forward(x, params):
    B, T, C = x.shape
    outs = []
    for h in range(params["wq"].shape[0]):
        q = x @ params["wq"][h]
        k = x @ params["wk"][h]
        v = x @ params["wv"][h]
        s = (q @ jnp.swapaxes(k, -2, -1)) * (C ** -0.5)
        mask = jnp.tril(jnp.ones((T, T), dtype=bool))
        s = jnp.where(mask, s, -jnp.inf)
        p = jax.nn.softmax(s, axis=-1)
        outs.append(p @ v)
    concat = jnp.concatenate(outs, axis=-1)
    return concat @ params["w_proj"] + params["b_proj"][0]


if __name__ == "__main__":
    # Small shapes consistent with the module: n_embd = n_heads * head_size.
    B, T = 2, 8
    n_embd, n_heads, head_size, block_size = 32, 4, 8, 8

    key = jax.random.PRNGKey(0)
    kx, kq, kk, kv, kw, kb = jax.random.split(key, 6)

    x = jax.random.normal(kx, (B, T, n_embd), dtype=jnp.float32)

    # Deterministic parameter init.  nn.Linear(in, out) weights are (out, in);
    # we generate (n_heads, out, in) then transpose so kernels compute x @ W.
    wq = jnp.transpose(
        jax.random.normal(kq, (n_heads, head_size, n_embd), jnp.float32) * 0.1,
        (0, 2, 1),
    )
    wk = jnp.transpose(
        jax.random.normal(kk, (n_heads, head_size, n_embd), jnp.float32) * 0.1,
        (0, 2, 1),
    )
    wv = jnp.transpose(
        jax.random.normal(kv, (n_heads, head_size, n_embd), jnp.float32) * 0.1,
        (0, 2, 1),
    )
    w_proj = jnp.transpose(
        jax.random.normal(kw, (n_embd, n_embd), jnp.float32) * 0.1, (1, 0)
    )
    b_proj = (jax.random.normal(kb, (n_embd,), jnp.float32) * 0.1).reshape(1, n_embd)

    params = dict(wq=wq, wk=wk, wv=wv, w_proj=w_proj, b_proj=b_proj)

    out = multi_heads_forward(x, params)
    out = jax.block_until_ready(out)

    ref = reference_forward(x, params)
    assert out.shape == (B, T, n_embd)
    # Slightly looser tolerance: softmax normalization uses the EUP approximate
    # reciprocal (pl.reciprocal(..., approx=True)).
    assert jnp.allclose(out, ref, atol=2e-3, rtol=2e-3), float(
        jnp.max(jnp.abs(out - ref))
    )

    print("KERNEL_OK")
</pallas_src>

<mosaic_0001>
module attributes {stable_mosaic.version = 11 : i64} {
  func.func @_mha_kernel(%arg0: i32, %arg1: i32, %arg2: memref<1x8x32xf32, #tpu.memory_space<vmem>>, %arg3: memref<32x32xf32, #tpu.memory_space<vmem>>, %arg4: memref<32x32xf32, #tpu.memory_space<vmem>>, %arg5: memref<32x32xf32, #tpu.memory_space<vmem>>, %arg6: memref<32x32xf32, #tpu.memory_space<vmem>>, %arg7: memref<1x32xf32, #tpu.memory_space<vmem>>, %arg8: memref<1x8x32xf32, #tpu.memory_space<vmem>>, %arg9: memref<8x32xf32, #tpu.memory_space<vmem>>, %arg10: memref<8x32xf32, #tpu.memory_space<vmem>>) attributes {dimension_semantics = [#tpu.dimension_semantics<parallel>, #tpu.dimension_semantics<arbitrary>], iteration_bounds = array<i64: 2, 1>, scalar_prefetch = 0 : i64, scratch_operands = 2 : i64, tpu.core_type = #tpu.core_type<tc>, window_params = [{transform_indices = @transform_0, window_bounds = array<i64: 1, 8, 32>}, {pipeline_mode = #tpu.pipeline_mode<synchronous>, transform_indices = @transform_1, window_bounds = array<i64: 32, 32>}, {pipeline_mode = #tpu.pipeline_mode<synchronous>, transform_indices = @transform_2, window_bounds = array<i64: 32, 32>}, {pipeline_mode = #tpu.pipeline_mode<synchronous>, transform_indices = @transform_3, window_bounds = array<i64: 32, 32>}, {pipeline_mode = #tpu.pipeline_mode<synchronous>, transform_indices = @transform_4, window_bounds = array<i64: 32, 32>}, {pipeline_mode = #tpu.pipeline_mode<synchronous>, transform_indices = @transform_5, window_bounds = array<i64: 1, 32>}, {transform_indices = @transform_6, window_bounds = array<i64: 1, 8, 32>}]} {
    %c0_i32 = arith.constant 0 : i32
    %0 = arith.cmpi eq, %arg1, %c0_i32 : i32
    %1 = arith.extui %0 : i1 to i32
    %c0_i32_0 = arith.constant 0 : i32
    %2 = arith.cmpi ne, %1, %c0_i32_0 : i32
    scf.if %2 {
      %c0_41 = arith.constant 0 : index
      %c0_42 = arith.constant 0 : index
      %c0_43 = arith.constant 0 : index
      %103 = vector.load %arg2[%c0_41, %c0_42, %c0_43] : memref<1x8x32xf32, #tpu.memory_space<vmem>>, vector<1x8x32xf32>
      %104 = vector.shape_cast %103 : vector<1x8x32xf32> to vector<8x32xf32>
      %c0_44 = arith.constant 0 : index
      %c0_45 = arith.constant 0 : index
      %105 = vector.load %arg4[%c0_44, %c0_45] : memref<32x32xf32, #tpu.memory_space<vmem>>, vector<32x32xf32>
      %cst_46 = arith.constant dense<0.000000e+00> : vector<8x32xf32>
      %106 = tpu.matmul %104, %105, %cst_46 {dimension_numbers = #tpu.dot_dimension_numbers<[1], [0], [0], [1], [0, 0, 1, 1], [], []>} : vector<8x32xf32>, vector<32x32xf32>, vector<8x32xf32> -> vector<8x32xf32>
      %c0_47 = arith.constant 0 : index
      %c0_48 = arith.constant 0 : index
      %107 = vector.load %arg9[%c0_47, %c0_48] : memref<8x32xf32, #tpu.memory_space<vmem>>, vector<8x32xf32>
      tpu.vector_store %arg9[%c0_47, %c0_48], %106 {strides = array<i32>} : memref<8x32xf32, #tpu.memory_space<vmem>>, vector<8x32xf32>,
      %c0_49 = arith.constant 0 : index
      %c0_50 = arith.constant 0 : index
      %108 = vector.load %arg5[%c0_49, %c0_50] : memref<32x32xf32, #tpu.memory_space<vmem>>, vector<32x32xf32>
      %cst_51 = arith.constant dense<0.000000e+00> : vector<8x32xf32>
      %109 = tpu.matmul %104, %108, %cst_51 {dimension_numbers = #tpu.dot_dimension_numbers<[1], [0], [0], [1], [0, 0, 1, 1], [], []>} : vector<8x32xf32>, vector<32x32xf32>, vector<8x32xf32> -> vector<8x32xf32>
      %c0_52 = arith.constant 0 : index
      %c0_53 = arith.constant 0 : index
      %110 = vector.load %arg10[%c0_52, %c0_53] : memref<8x32xf32, #tpu.memory_space<vmem>>, vector<8x32xf32>
      tpu.vector_store %arg10[%c0_52, %c0_53], %109 {strides = array<i32>} : memref<8x32xf32, #tpu.memory_space<vmem>>, vector<8x32xf32>,
    } else {
    }
    %c8_i32 = arith.constant 8 : i32
    %3 = arith.muli %arg1, %c8_i32 : i32
    %4 = tpu.assume_multiple %3, 8 : i32
    %c0 = arith.constant 0 : index
    %5 = arith.index_cast %4 : i32 to index
    %c0_1 = arith.constant 0 : index
    %6 = vector.load %arg2[%c0, %5, %c0_1] : memref<1x8x32xf32, #tpu.memory_space<vmem>>, vector<1x8x32xf32>
    %7 = vector.shape_cast %6 : vector<1x8x32xf32> to vector<8x32xf32>
    %c0_2 = arith.constant 0 : index
    %c0_3 = arith.constant 0 : index
    %8 = vector.load %arg3[%c0_2, %c0_3] : memref<32x32xf32, #tpu.memory_space<vmem>>, vector<32x32xf32>
    %cst = arith.constant dense<0.000000e+00> : vector<8x32xf32>
    %9 = tpu.matmul %7, %8, %cst {dimension_numbers = #tpu.dot_dimension_numbers<[1], [0], [0], [1], [0, 0, 1, 1], [], []>} : vector<8x32xf32>, vector<32x32xf32>, vector<8x32xf32> -> vector<8x32xf32>
    %c0_4 = arith.constant 0 : index
    %c0_5 = arith.constant 0 : index
    %10 = vector.load %arg9[%c0_4, %c0_5] : memref<8x32xf32, #tpu.memory_space<vmem>>, vector<8x32xf32>
    %c0_6 = arith.constant 0 : index
    %c0_7 = arith.constant 0 : index
    %11 = vector.load %arg10[%c0_6, %c0_7] : memref<8x32xf32, #tpu.memory_space<vmem>>, vector<8x32xf32>
    %c8_i32_8 = arith.constant 8 : i32
    %12 = arith.muli %arg1, %c8_i32_8 : i32
    %13 = tpu.iota {dimensions = array<i32: 0>} : vector<8x8xi32>
    %14 = vector.broadcast %12 : i32 to vector<8x8xi32>
    %15 = arith.addi %14, %13 : vector<8x8xi32>
    %16 = tpu.iota {dimensions = array<i32: 1>} : vector<8x8xi32>
    %17 = arith.cmpi sge, %15, %16 : vector<8x8xi32>
    %18 = vector.extract_strided_slice %9 {offsets = [0, 0], sizes = [8, 8], strides = [1, 1]} : vector<8x32xf32> to vector<8x8xf32>
    %19 = vector.extract_strided_slice %10 {offsets = [0, 0], sizes = [8, 8], strides = [1, 1]} : vector<8x32xf32> to vector<8x8xf32>
    %20 = vector.extract_strided_slice %11 {offsets = [0, 0], sizes = [8, 8], strides = [1, 1]} : vector<8x32xf32> to vector<8x8xf32>
    %cst_9 = arith.constant dense<0.000000e+00> : vector<8x8xf32>
    %21 = tpu.matmul %18, %19, %cst_9 {dimension_numbers = #tpu.dot_dimension_numbers<[1], [1], [0], [0], [0, 0, 1, 0], [], []>} : vector<8x8xf32>, vector<8x8xf32>, vector<8x8xf32> -> vector<8x8xf32>
    %cst_10 = arith.constant 0.176776692 : f32
    %22 = vector.broadcast %cst_10 : f32 to vector<8x8xf32>
    %23 = arith.mulf %21, %22 : vector<8x8xf32>
    %cst_11 = arith.constant 0xFF800000 : f32
    %24 = vector.broadcast %cst_11 : f32 to vector<8x8xf32>
    %25 = arith.select %17, %23, %24 : vector<8x8xi1>, vector<8x8xf32>
    %cst_12 = arith.constant dense<0xFF800000> : vector<8xf32>
    %26 = vector.multi_reduction <maximumf>, %25, %cst_12 [1] : vector<8x8xf32> to vector<8xf32>
    %27 = vector.shape_cast %26 : vector<8xf32> to vector<8x1xf32>
    %28 = vector.broadcast %27 : vector<8x1xf32> to vector<8x8xf32>
    %29 = arith.subf %25, %28 : vector<8x8xf32>
    %30 = math.exp %29 : vector<8x8xf32>
    %cst_13 = arith.constant dense<0.000000e+00> : vector<8xf32>
    %31 = vector.multi_reduction <add>, %30, %cst_13 [1] : vector<8x8xf32> to vector<8xf32>
    %32 = vector.shape_cast %31 : vector<8xf32> to vector<8x1xf32>
    %33 = tpu.reciprocal %32 {approx = true} : vector<8x1xf32> -> vector<8x1xf32>
    %34 = vector.broadcast %33 : vector<8x1xf32> to vector<8x8xf32>
    %35 = arith.mulf %30, %34 : vector<8x8xf32>
    %cst_14 = arith.constant dense<0.000000e+00> : vector<8x8xf32>
    %36 = tpu.matmul %35, %20, %cst_14 {dimension_numbers = #tpu.dot_dimension_numbers<[1], [0], [0], [1], [0, 0, 1, 1], [], []>} : vector<8x8xf32>, vector<8x8xf32>, vector<8x8xf32> -> vector<8x8xf32>
    %37 = vector.extract_strided_slice %9 {offsets = [0, 8], sizes = [8, 8], strides = [1, 1]} : vector<8x32xf32> to vector<8x8xf32>
    %38 = vector.extract_strided_slice %10 {offsets = [0, 8], sizes = [8, 8], strides = [1, 1]} : vector<8x32xf32> to vector<8x8xf32>
    %39 = vector.extract_strided_slice %11 {offsets = [0, 8], sizes = [8, 8], strides = [1, 1]} : vector<8x32xf32> to vector<8x8xf32>
    %cst_15 = arith.constant dense<0.000000e+00> : vector<8x8xf32>
    %40 = tpu.matmul %37, %38, %cst_15 {dimension_numbers = #tpu.dot_dimension_numbers<[1], [1], [0], [0], [0, 0, 1, 0], [], []>} : vector<8x8xf32>, vector<8x8xf32>, vector<8x8xf32> -> vector<8x8xf32>
    %cst_16 = arith.constant 0.176776692 : f32
    %41 = vector.broadcast %cst_16 : f32 to vector<8x8xf32>
    %42 = arith.mulf %40, %41 : vector<8x8xf32>
    %cst_17 = arith.constant 0xFF800000 : f32
    %43 = vector.broadcast %cst_17 : f32 to vector<8x8xf32>
    %44 = arith.select %17, %42, %43 : vector<8x8xi1>, vector<8x8xf32>
    %cst_18 = arith.constant dense<0xFF800000> : vector<8xf32>
    %45 = vector.multi_reduction <maximumf>, %44, %cst_18 [1] : vector<8x8xf32> to vector<8xf32>
    %46 = vector.shape_cast %45 : vector<8xf32> to vector<8x1xf32>
    %47 = vector.broadcast %46 : vector<8x1xf32> to vector<8x8xf32>
    %48 = arith.subf %44, %47 : vector<8x8xf32>
    %49 = math.exp %48 : vector<8x8xf32>
    %cst_19 = arith.constant dense<0.000000e+00> : vector<8xf32>
    %50 = vector.multi_reduction <add>, %49, %cst_19 [1] : vector<8x8xf32> to vector<8xf32>
    %51 = vector.shape_cast %50 : vector<8xf32> to vector<8x1xf32>
    %52 = tpu.reciprocal %51 {approx = true} : vector<8x1xf32> -> vector<8x1xf32>
    %53 = vector.broadcast %52 : vector<8x1xf32> to vector<8x8xf32>
    %54 = arith.mulf %49, %53 : vector<8x8xf32>
    %cst_20 = arith.constant dense<0.000000e+00> : vector<8x8xf32>
    %55 = tpu.matmul %54, %39, %cst_20 {dimension_numbers = #tpu.dot_dimension_numbers<[1], [0], [0], [1], [0, 0, 1, 1], [], []>} : vector<8x8xf32>, vector<8x8xf32>, vector<8x8xf32> -> vector<8x8xf32>
    %56 = vector.extract_strided_slice %9 {offsets = [0, 16], sizes = [8, 8], strides = [1, 1]} : vector<8x32xf32> to vector<8x8xf32>
    %57 = vector.extract_strided_slice %10 {offsets = [0, 16], sizes = [8, 8], strides = [1, 1]} : vector<8x32xf32> to vector<8x8xf32>
    %58 = vector.extract_strided_slice %11 {offsets = [0, 16], sizes = [8, 8], strides = [1, 1]} : vector<8x32xf32> to vector<8x8xf32>
    %cst_21 = arith.constant dense<0.000000e+00> : vector<8x8xf32>
    %59 = tpu.matmul %56, %57, %cst_21 {dimension_numbers = #tpu.dot_dimension_numbers<[1], [1], [0], [0], [0, 0, 1, 0], [], []>} : vector<8x8xf32>, vector<8x8xf32>, vector<8x8xf32> -> vector<8x8xf32>
    %cst_22 = arith.constant 0.176776692 : f32
    %60 = vector.broadcast %cst_22 : f32 to vector<8x8xf32>
    %61 = arith.mulf %59, %60 : vector<8x8xf32>
    %cst_23 = arith.constant 0xFF800000 : f32
    %62 = vector.broadcast %cst_23 : f32 to vector<8x8xf32>
    %63 = arith.select %17, %61, %62 : vector<8x8xi1>, vector<8x8xf32>
    %cst_24 = arith.constant dense<0xFF800000> : vector<8xf32>
    %64 = vector.multi_reduction <maximumf>, %63, %cst_24 [1] : vector<8x8xf32> to vector<8xf32>
    %65 = vector.shape_cast %64 : vector<8xf32> to vector<8x1xf32>
    %66 = vector.broadcast %65 : vector<8x1xf32> to vector<8x8xf32>
    %67 = arith.subf %63, %66 : vector<8x8xf32>
    %68 = math.exp %67 : vector<8x8xf32>
    %cst_25 = arith.constant dense<0.000000e+00> : vector<8xf32>
    %69 = vector.multi_reduction <add>, %68, %cst_25 [1] : vector<8x8xf32> to vector<8xf32>
    %70 = vector.shape_cast %69 : vector<8xf32> to vector<8x1xf32>
    %71 = tpu.reciprocal %70 {approx = true} : vector<8x1xf32> -> vector<8x1xf32>
    %72 = vector.broadcast %71 : vector<8x1xf32> to vector<8x8xf32>
    %73 = arith.mulf %68, %72 : vector<8x8xf32>
    %cst_26 = arith.constant dense<0.000000e+00> : vector<8x8xf32>
    %74 = tpu.matmul %73, %58, %cst_26 {dimension_numbers = #tpu.dot_dimension_numbers<[1], [0], [0], [1], [0, 0, 1, 1], [], []>} : vector<8x8xf32>, vector<8x8xf32>, vector<8x8xf32> -> vector<8x8xf32>
    %75 = vector.extract_strided_slice %9 {offsets = [0, 24], sizes = [8, 8], strides = [1, 1]} : vector<8x32xf32> to vector<8x8xf32>
    %76 = vector.extract_strided_slice %10 {offsets = [0, 24], sizes = [8, 8], strides = [1, 1]} : vector<8x32xf32> to vector<8x8xf32>
    %77 = vector.extract_strided_slice %11 {offsets = [0, 24], sizes = [8, 8], strides = [1, 1]} : vector<8x32xf32> to vector<8x8xf32>
    %cst_27 = arith.constant dense<0.000000e+00> : vector<8x8xf32>
    %78 = tpu.matmul %75, %76, %cst_27 {dimension_numbers = #tpu.dot_dimension_numbers<[1], [1], [0], [0], [0, 0, 1, 0], [], []>} : vector<8x8xf32>, vector<8x8xf32>, vector<8x8xf32> -> vector<8x8xf32>
    %cst_28 = arith.constant 0.176776692 : f32
    %79 = vector.broadcast %cst_28 : f32 to vector<8x8xf32>
    %80 = arith.mulf %78, %79 : vector<8x8xf32>
    %cst_29 = arith.constant 0xFF800000 : f32
    %81 = vector.broadcast %cst_29 : f32 to vector<8x8xf32>
    %82 = arith.select %17, %80, %81 : vector<8x8xi1>, vector<8x8xf32>
    %cst_30 = arith.constant dense<0xFF800000> : vector<8xf32>
    %83 = vector.multi_reduction <maximumf>, %82, %cst_30 [1] : vector<8x8xf32> to vector<8xf32>
    %84 = vector.shape_cast %83 : vector<8xf32> to vector<8x1xf32>
    %85 = vector.broadcast %84 : vector<8x1xf32> to vector<8x8xf32>
    %86 = arith.subf %82, %85 : vector<8x8xf32>
    %87 = math.exp %86 : vector<8x8xf32>
    %cst_31 = arith.constant dense<0.000000e+00> : vector<8xf32>
    %88 = vector.multi_reduction <add>, %87, %cst_31 [1] : vector<8x8xf32> to vector<8xf32>
    %89 = vector.shape_cast %88 : vector<8xf32> to vector<8x1xf32>
    %90 = tpu.reciprocal %89 {approx = true} : vector<8x1xf32> -> vector<8x1xf32>
    %91 = vector.broadcast %90 : vector<8x1xf32> to vector<8x8xf32>
    %92 = arith.mulf %87, %91 : vector<8x8xf32>
    %cst_32 = arith.constant dense<0.000000e+00> : vector<8x8xf32>
    %93 = tpu.matmul %92, %77, %cst_32 {dimension_numbers = #tpu.dot_dimension_numbers<[1], [0], [0], [1], [0, 0, 1, 1], [], []>} : vector<8x8xf32>, vector<8x8xf32>, vector<8x8xf32> -> vector<8x8xf32>
    %94 = tpu.concatenate %36, %55, %74, %93 in 1 : vector<8x8xf32>, vector<8x8xf32>, vector<8x8xf32>, vector<8x8xf32> -> vector<8x32xf32>
    %c0_33 = arith.constant 0 : index
    %c0_34 = arith.constant 0 : index
    %95 = vector.load %arg6[%c0_33, %c0_34] : memref<32x32xf32, #tpu.memory_space<vmem>>, vector<32x32xf32>
    %cst_35 = arith.constant dense<0.000000e+00> : vector<8x32xf32>
    %96 = tpu.matmul %94, %95, %cst_35 {dimension_numbers = #tpu.dot_dimension_numbers<[1], [0], [0], [1], [0, 0, 1, 1], [], []>} : vector<8x32xf32>, vector<32x32xf32>, vector<8x32xf32> -> vector<8x32xf32>
    %c0_36 = arith.constant 0 : index
    %c0_37 = arith.constant 0 : index
    %97 = vector.load %arg7[%c0_36, %c0_37] : memref<1x32xf32, #tpu.memory_space<vmem>>, vector<1x32xf32>
    %98 = vector.broadcast %97 : vector<1x32xf32> to vector<8x32xf32>
    %99 = arith.addf %96, %98 : vector<8x32xf32>
    %c0_38 = arith.constant 0 : index
    %c0_39 = arith.constant 0 : index
    %c0_40 = arith.constant 0 : index
    %100 = vector.load %arg8[%c0_38, %c0_39, %c0_40] : memref<1x8x32xf32, #tpu.memory_space<vmem>>, vector<1x8x32xf32>
    %101 = vector.shape_cast %100 : vector<1x8x32xf32> to vector<8x32xf32>
    %102 = vector.shape_cast %99 : vector<8x32xf32> to vector<1x8x32xf32>
    tpu.vector_store %arg8[%c0_38, %c0_39, %c0_40], %102 {strides = array<i32>} : memref<1x8x32xf32, #tpu.memory_space<vmem>>, vector<1x8x32xf32>,
    return
  }
  func.func @transform_0(%arg0: i32, %arg1: i32) -> (i32, i32, i32) {
    %c0_i32 = arith.constant 0 : i32
    %c0_i32_0 = arith.constant 0 : i32
    %c0_i32_1 = arith.constant 0 : i32
    return %arg0, %c0_i32, %c0_i32_0 : i32, i32, i32
  }
  func.func @transform_1(%arg0: i32, %arg1: i32) -> (i32, i32) {
    %c0_i32 = arith.constant 0 : i32
    %c0_i32_0 = arith.constant 0 : i32
    %c0_i32_1 = arith.constant 0 : i32
    return %c0_i32, %c0_i32_0 : i32, i32
  }
  func.func @transform_2(%arg0: i32, %arg1: i32) -> (i32, i32) {
    %c0_i32 = arith.constant 0 : i32
    %c0_i32_0 = arith.constant 0 : i32
    %c0_i32_1 = arith.constant 0 : i32
    return %c0_i32, %c0_i32_0 : i32, i32
  }
  func.func @transform_3(%arg0: i32, %arg1: i32) -> (i32, i32) {
    %c0_i32 = arith.constant 0 : i32
    %c0_i32_0 = arith.constant 0 : i32
    %c0_i32_1 = arith.constant 0 : i32
    return %c0_i32, %c0_i32_0 : i32, i32
  }
  func.func @transform_4(%arg0: i32, %arg1: i32) -> (i32, i32) {
    %c0_i32 = arith.constant 0 : i32
    %c0_i32_0 = arith.constant 0 : i32
    %c0_i32_1 = arith.constant 0 : i32
    return %c0_i32, %c0_i32_0 : i32, i32
  }
  func.func @transform_5(%arg0: i32, %arg1: i32) -> (i32, i32) {
    %c0_i32 = arith.constant 0 : i32
    %c0_i32_0 = arith.constant 0 : i32
    %c0_i32_1 = arith.constant 0 : i32
    return %c0_i32, %c0_i32_0 : i32, i32
  }
  func.func @transform_6(%arg0: i32, %arg1: i32) -> (i32, i32, i32) {
    %c0_i32 = arith.constant 0 : i32
    %c0_i32_0 = arith.constant 0 : i32
    return %arg0, %arg1, %c0_i32 : i32, i32, i32
  }
}

</mosaic_0001>

<bundles_post_ra>
// kernel: tpu_custom_call.1
= control target key start
LH: loop header
LB: loop body
LE: loop exit
PB: predicated region body
PF: predicated region fallthrough
CT: control target
= control target key end

     0   :  { %11 = vsyncpa [#allocation5], 0  ;;  %s1566_s0 = inlined_call_operand.hbm [shape: f32[2,8,32], index: 0, kind: input, shape index: {}]   ;;  %s1567_s1 = inlined_call_operand.hbm [shape: f32[32,32], index: 1, kind: input, shape index: {}]   ;;  %s1568_s2 = inlined_call_operand.hbm [shape: f32[32,32], index: 2, kind: input, shape index: {}]   ;;  %s1569_s3 = inlined_call_operand.hbm [shape: f32[32,32], index: 3, kind: input, shape index: {}]   ;;  %s1570_s4 = inlined_call_operand.hbm [shape: f32[32,32], index: 4, kind: input, shape index: {}]   ;;  %s1571_s5 = inlined_call_operand.vmem [shape: f32[1,32], index: 5, kind: input, shape index: {}]   ;;  %s1572_s6 = inlined_call_operand.hbm [shape: f32[2,8,32], index: 6, kind: output, shape index: {}]  }
   0x1   :  { %13 = vsyncpa [#allocation5 + $0x1], 0 }
   0x2   :  { %14 = vsyncpa [#allocation8], 0 }
   0x3   :  { %15 = vsyncpa [#allocation11], 0 }
   0x4   :  { %16 = vsyncpa [#allocation6], 0 }
   0x5   :  { %18 = vsyncpa [#allocation6 + $0x1], 0  ;;  %s1352_s21 = smov 0   ;;  %s1354_s22 = smov 0  }
   0x6   :  { %s1356_s23 = smov 0   ;;  %s1358_s24 = smov 0  }
   0x7   :  { %s1360_s25 = smov 0   ;;  %s1362_s26 = smov 0  }
   0x8 LB: > { %s898_s27 = sadd.s32 4294967295, %s1303_s26   ;;  %p900_p0 = scmp.ge.s32.totalorder %s1303_s26, 1  ;;  %s1303_s26 = sphi %s1362_s26, %s24_s26   ;;  %s1299_s25 = sphi %s1360_s25, %s1583_s25   ;;  %s1295_s24 = sphi %s1358_s24, %s1582_s24   ;;  %s1291_s23 = sphi %s1356_s23, %s1581_s23   ;;  %s1287_s22 = sphi %s1354_s22, %s1580_s22   ;;  %s1283_s21 = sphi %s1352_s21, %s1579_s21  }
   0x9   : > { %p1386_p1 = scmp.eq.s32.totalorder %s898_s27, 0  ;;  %p200_p2 = scmp.lt.s32.totalorder %s1303_s26, 3 }
   0xa   : > { %s211_s7 = sshll.u32 %s1567_s1, 4  ;;  %s1305_s9 = smov [#allocation7]   ;;  %s212_s7 = int_to_ptr.hbm [resolvable:$true] %s211_s7 }
   0xb   : > { %p1394_p3 = pnand %p900_p0, %p200_p2  ;;  %s213_s10 = sshll.u32 %s1305_s9, 4  ;;  %s214_s10 = int_to_ptr.vmem [resolvable:$true] %s213_s10 }
   0xc   : > { %p905_p6 = scmp.ge.s32.totalorder %s1303_s26, 2  ;;  %s239_s14 = sshll.u32 %s1569_s3, 4  ;;  %s240_s14 = int_to_ptr.hbm [resolvable:$true] %s239_s14 }
   0xd   : > { %p955_p4 = pneg %p1394_p3  ;;  %s1306_s15 = smov 128  }
   0xe   : > { %s1307_s16 = smov 8   ;;  %s1308_s17 = smov [#allocation10]  }
   0xf   : > { %p1402_p5 = pnand %p955_p4, %p1386_p1  ;;  %s241_s18 = sshll.u32 %s1308_s17, 4  ;;  %s242_s18 = int_to_ptr.vmem [resolvable:$true] %s241_s18 }
  0x10   : > { %s225_s29 = sshll.u32 %s1568_s2, 4  ;;  %s1310_s13 = smov [#allocation12]   ;;  %s226_s29 = int_to_ptr.hbm [resolvable:$true] %s225_s29 }
  0x11   : > { %958 = dma.hbm_to_vmem [thread:$0]  (!%p1402_p5), %s212_s7, 512, %s214_s10, [#allocation8], %s1306_s15, %s1306_s15, %s1307_s16  }
  0x12   : > { %964 = dma.hbm_to_vmem [thread:$0]  (!%p1402_p5), %s240_s14, 512, %s242_s18, [#allocation11], %s1306_s15, %s1306_s15, %s1307_s16  }
  0x13   : > { %s253_s7 = sshll.u32 %s1570_s4, 4  ;;  %s1309_s10 = smov [#allocation9]   ;;  %s254_s7 = int_to_ptr.hbm [resolvable:$true] %s253_s7 }
  0x14   : > { %s227_s12 = sshll.u32 %s1309_s10, 4  ;;  %s255_s17 = sshll.u32 %s1310_s13, 4  ;;  %s228_s12 = int_to_ptr.vmem [resolvable:$true] %s227_s12  ;;  %s256_s17 = int_to_ptr.vmem [resolvable:$true] %s255_s17 }
  0x15   : > { %961 = dma.hbm_to_vmem [thread:$0]  (!%p1402_p5), %s226_s29, 512, %s228_s12, [#allocation8], %s1306_s15, %s1306_s15, %s1307_s16  }
  0x16   : > { %967 = dma.hbm_to_vmem [thread:$0]  (!%p1402_p5), %s254_s7, 512, %s256_s17, [#allocation11], %s1306_s15, %s1306_s15, %s1307_s16  }
  0x17   : > { %s36_s14 = sadd.s32 1, %s1299_s25  ;;  %s899_s18 = sadd.s32 4294967294, %s1303_s26  }
  0x18   : > { %p38_p7 = scmp.ge.s32.totalorder %s36_s14, 2  ;;  %s43_s19 = sadd.s32 1, %s1291_s23 }
  0x19   : > { %p50_p8 = scmp.ne.s32.totalorder %s1291_s23, %s1287_s22  ;;  %p51_p9 = scmp.eq.s32.totalorder %s1303_s26, 0 }
  0x1a   : > { %s1585_s14 = smov (%p38_p7, %s36_s14), 0  ;;  %p56_p10 = scmp.ne.s32.totalorder %s1287_s22, %s1283_s21 }
  0x1b   : > { %s40_s20 = ssub.s32 %s1299_s25, %s1585_s14  ;;  %p187_p11 = scmp.eq.s32.totalorder %s898_s27, 1 }
  0x1c   : > { %p41_p12 = scmp.eq.s32.totalorder %s40_s20, 0  ;;  %p1440_p13 = por %p1386_p1, %p56_p10 }
  0x1d   : > { %p1444_p0 = por %p187_p11, %p50_p8  ;;  %p193_p2 = scmp.eq.s32.totalorder %s899_s18, 1 }
  0x1e   : > { %s1449_s16 = scalar_select %p41_p12, %s1291_s23, %s43_s19  }
  0x1f   : > { %p52_p4 = por %p51_p9, %p50_p8  ;;  %p1451_p5 = por %p193_p2, %p56_p10 }
  0x20   : > { %s272_s30 = sand.u32 1, %s1291_s23   ;;  %s907_s27 = sshll.u32 %s1299_s25, 3 }
  0x21   : > { %p980_p7 = scmp.lt.s32.totalorder %s1303_s26, 2  ;;  %s906_s9 = sshll.u32 %s272_s30, 3 }
  0x22   : > { %s280_s12 = scalar_lea.hbm %s1566_s0, %s907_s27  ;;  %s276_s17 = scalar_lea.vmem [#allocation4], %s906_s9 }
  0x23   : > { %s282_s13 = sshll.u32 %s280_s12, 4  ;;  %s284_s20 = sshll.u32 %s276_s17, 4  ;;  %s283_s13 = int_to_ptr.hbm [resolvable:$true] %s282_s13  ;;  %s285_s20 = int_to_ptr.vmem [resolvable:$true] %s284_s20 }
  0x24   : > { %p969_p11 = pnand %p980_p7, %p52_p4  ;;  %s273_s18 = scalar_lea.sflag [#allocation5], %s272_s30 }
  0x25   : > { %293 = sbr.rel (%p1394_p3) target bundleno = 1092 (0x444), region = 44  ;;  %s1464_s19 = sand.u32 (!%p1394_p3), 1, %s1287_s22  }
  0x26   : > { %971 = dma.hbm_to_vmem [thread:$0]  (!%p969_p11), %s283_s13, 128, %s285_s20, %s273_s18  }
  0x27   : > { %s909_s7 = sshll.u32 (!%p1394_p3), %s1464_s19, 3  ;;  %s296_s27 = scalar_lea.sflag (!%p1394_p3), [#allocation5], %s1464_s19 }
  0x28   : > { %s299_s9 = scalar_lea.vmem (!%p1394_p3), [#allocation4], %s909_s7 }
  0x2a   : > { %1266 = dma.done.wait (%p1440_p13), %s296_s27, 128  }
  0x2b   : > { %1268 = vsyncadd (%p1440_p13), %s296_s27, 4294967168 }
  0x2c   : > { %1270 = dma.done.wait (%p1386_p1), [#allocation8], 1024  }
  0x2d   : > { %1272 = vsyncadd (%p1386_p1), [#allocation8], 4294966272 }
  0x2e   : > { %1274 = dma.done.wait (%p1386_p1), [#allocation11], 1024  }
  0x2f   : > { %1276 = vsyncadd (%p1386_p1), [#allocation11], 4294966272  ;;  %v357_v0 = vld [vmem:[#allocation9 + $0x18] sm:$0xff]  ;;  %v356_v1 = vld [vmem:[#allocation9 + $0x10] sm:$0xff]  ;;  %vm358_vm0 = vcmask 261120   ;;  %vm448_vm1 = vcmask 64512   ;;  %v441_v17 = vlaneseq }
  0x30   : > { %374 = vmatpush.msra.mxu0 %v357_v0  ;;  %v414_v2 = vld [vmem:[#allocation7 + $0x18] sm:$0xff]  ;;  %v355_v3 = vld [vmem:[#allocation9 + $0x8] sm:$0xff]  ;;  %v413_v4 = vld [vmem:[#allocation7 + $0x10] sm:$0xff]  ;;  %s1311_s28 = smov 104   ;;  %s1312_s8 = smov 120   ;;  %vm726_vm3 = vcmask 130048  }
  0x31   : > { %431 = vmatpush.msra.mxu2 %v414_v2  ;;  %v412_v5 = vld [vmem:[#allocation7 + $0x8] sm:$0xff]  ;;  %v354_v6 = vld [vmem:[#allocation9] sm:$0xff]  ;;  %v353_v7 = vld [vmem:[%s299_s9] sm:$0xff]  ;;  %s1313_s11 = smov 112   ;;  %v442_v19 = vshrl.u32 %v441_v17, 7  ;;  %v446_v20 = vand.u32 127, %v441_v17 }
  0x32   : > { %375 = vmatpush.msra.mxu0 %v356_v1  ;;  %v411_v8 = vld [vmem:[#allocation7] sm:$0xff]  ;;  %v386_v25 = vld [vmem:[#allocation10 + $0x18] sm:$0xff]  ;;  %v385_v26 = vld [vmem:[#allocation10 + $0x10] sm:$0xff]  ;;  %s1314_s30 = smov 16   ;;  %s1315_s10 = smov 8   ;;  %vm728_vm4 = vcmask 195584  }
  0x33   : > { %432 = vmatpush.msra.mxu2 %v413_v4  ;;  %vm447_vm2 = vcmp.ge.s32.totalorder %v442_v19, %v446_v20  ;;  %399 = vmatpush.msra.mxu1 %v386_v25  ;;  %v384_v27 = vld [vmem:[#allocation10 + $0x8] sm:$0xff]  ;;  %v383_v28 = vld [vmem:[#allocation10] sm:$0xff]  ;;  %s1316_s12 = smov 24   ;;  %v732_v19 = vld [vmem:[#allocation12 + $0x10] sm:$0xff]  ;;  %s932_s13 = sshll.u32 %s1295_s24, 3 }
  0x34   : > { %376 = vmatpush.msra.mxu0 %v355_v3  ;;  %v731_v20 = vld [vmem:[#allocation12 + $0x8] sm:$0xff]  ;;  %s774_s18 = scalar_lea.hbm %s1572_s6, %s932_s13  ;;  %s763_s24 = scalar_lea.sflag [#allocation6], %s1464_s19 }
  0x35   : > { %433 = vmatpush.msra.mxu2 %v412_v5  ;;  %400 = vmatpush.msra.mxu1 %v385_v26 }
  0x36   : > { %377 = vmatpush.msra.mxu0 %v354_v6 }
  0x37   : > { %915 = vmatmul.msk.f32.vlgmr.msra.gmra.mxu0 %vm358_vm0, %v353_v7  ;;  %434 = vmatpush.msra.mxu2 %v411_v8 }
  0x38   : > { %917 = vmatmul.msk.f32.vlgmr.msra.gmra.mxu2 %vm358_vm0, %v353_v7  ;;  %401 = vmatpush.msra.mxu1 %v384_v27 }
  0x3a   : > { %402 = vmatpush.msra.mxu1 %v383_v28  ;;  %v1046_v28 = vld [vmem:[%s1571_s5] ss:$0 sm:$0xff] }
  0x3b   : > { %916 = vmatmul.msk.f32.vlgmr.msra.gmra.mxu1 %vm358_vm0, %v353_v7 }
  0xb4   : > { %v379_v9 = vpop.f32.mrf.mxu0 }
  0xb5   : > { %382 = vst.msk [vmem:[#allocation2] sm:$0xff] %vm358_vm0, %v379_v9 }
  0xb8   : > { %v404_v46 = vpop.f32.mrf.mxu1 }
  0xb9   : > { %407 = vst.msk [vmem:[#allocation3] sm:$0xff] %vm358_vm0, %v404_v46 }
  0xbb   : > { %v436_v11 = vpop.f32.mrf.mxu2 }
  0xbc   : > { %v439_v10 = vld [vmem:[#allocation2] sm:$0xff] }
  0xbd   : > { %648 = vrot.lane.b32.xlu2 %v439_v10, %s1311_s28  ;;  %513 = vrot.lane.b32.xlu1 %v439_v10, %s1312_s8 }
  0xbe   : > { %581 = vrot.lane.b32.xlu0 %v439_v10, %s1313_s11  ;;  %918 = vmatpush.xpose.msk.msra.mxu3 %vm448_vm1, %v439_v10 }
  0xc0   : > { %v440_v47 = vld [vmem:[#allocation3] sm:$0xff] }
  0xc1   : > { %919 = vmatmul.msk.f32.vlgmr.msra.gmra.mxu3 %vm448_vm1, %v436_v11 }
  0xc2   : > { %506 = vmatpush.msrb.mxu3 %v440_v47 }
  0xc5   : > { %646 = vrot.lane.b32.xlu2 %v436_v11, %s1311_s28  ;;  %511 = vrot.lane.b32.xlu1 %v436_v11, %s1312_s8 }
  0xc6   : > { %579 = vrot.lane.b32.xlu0 %v436_v11, %s1313_s11 }
 0x117   : > { %v649_v13 = vpop.permute.xlu2 %648 }
 0x11f   : > { %v647_v18 = vpop.permute.xlu2 %646 }
 0x12f   : > { %v514_v12 = vpop.permute.xlu1 %513 }
 0x130   : > { %v582_v14 = vpop.permute.xlu0 %581  ;;  %921 = vmatpush.xpose.msk.msrb.mxu0 %vm448_vm1, %v514_v12 }
 0x131   : > { %924 = vmatpush.xpose.msk.msrb.mxu2 %vm448_vm1, %v582_v14 }
 0x134   : > { %927 = vmatpush.xpose.msk.msra.mxu0 %vm448_vm1, %v649_v13 }
 0x137   : > { %v512_v15 = vpop.permute.xlu1 %511 }
 0x138   : > { %v580_v16 = vpop.permute.xlu0 %579  ;;  %922 = vmatmul.msk.f32.vlgmr.msrb.gmra.mxu0 %vm448_vm1, %v512_v15 }
 0x139   : > { %925 = vmatmul.msk.f32.vlgmr.msrb.gmra.mxu2 %vm448_vm1, %v580_v16 }
 0x140   : > { %928 = vmatmul.msk.f32.vlgmr.msra.gmra.mxu0 %vm448_vm1, %v647_v18  ;;  %v733_v18 = vld [vmem:[#allocation12 + $0x18] sm:$0xff] }
 0x141   : > { %753 = vmatpush.msra.mxu2 %v733_v18 }
 0x143   : > { %754 = vmatpush.msra.mxu2 %v732_v19 }
 0x144   : > { %v472_v21 = vpop.f32.mrf.mxu3 }
 0x145   : > { %v475_v22 = vmul.f32 0.17677669, %v472_v21  ;;  %755 = vmatpush.msra.mxu2 %v731_v20  ;;  %v730_v21 = vld [vmem:[#allocation12] sm:$0xff] }
 0x147   : > { %v476_v23 = vsel %vm447_vm2, %v475_v22, -inf  ;;  %756 = vmatpush.msra.mxu2 %v730_v21 }
 0x148   : > { %v477_v24 = vsel %vm448_vm1, %v476_v23, -inf }
 0x149   : > { %478 = vmax.xlane.f32.xlu0 %v477_v24 }
 0x1b5   : > { %v536_v29 = vpop.f32.mrf.mxu0 }
 0x1b6   : > { %v539_v30 = vmul.f32 0.17677669, %v536_v29 }
 0x1b8   : > { %v540_v31 = vsel %vm447_vm2, %v539_v30, -inf }
 0x1b9   : > { %v541_v32 = vsel %vm448_vm1, %v540_v31, -inf }
 0x1ba   : > { %542 = vmax.xlane.f32.xlu1 %v541_v32 }
 0x1bc   : > { %v604_v33 = vpop.f32.mrf.mxu2  ;;  %v479_v34 = vpop.xlane.xlu0 %478 }
 0x1bd   : > { %v607_v35 = vmul.f32 0.17677669, %v604_v33  ;;  %v480_v36 = vsub.f32 %v476_v23, %v479_v34  ;;  %v671_v37 = vpop.f32.mrf.mxu0 }
 0x1be   : > { %v674_v41 = vmul.f32 0.17677669, %v671_v37 }
 0x1bf   : > { %v481_v38 = vmul.f32 1.442695, %v480_v36  ;;  %v608_v39 = vsel %vm447_vm2, %v607_v35, -inf }
 0x1c0   : > { %v609_v40 = vsel %vm448_vm1, %v608_v39, -inf  ;;  %v675_v42 = vsel %vm447_vm2, %v674_v41, -inf }
 0x1c1   : > { %1047 = vpow2.f32 %v481_v38  ;;  %610 = vmax.xlane.f32.xlu2 %v609_v40  ;;  %v676_v44 = vsel %vm448_vm1, %v675_v42, -inf }
 0x1c7   : > { %v1048_v43 = vpop.eup %1047 }
 0x1c8   : > { %v483_v45 = vsel %vm448_vm1, %v1048_v43, 0.0 }
 0x1c9   : > { %677 = vmax.xlane.f32.xlu2 %v676_v44  ;;  %484 = vadd.xlane.f32.xlu0 %v483_v45 }
 0x22d   : > { %v543_v48 = vpop.xlane.xlu1 %542 }
 0x22e   : > { %v544_v49 = vsub.f32 %v540_v31, %v543_v48 }
 0x230   : > { %v545_v50 = vmul.f32 1.442695, %v544_v49 }
 0x232   : > { %1049 = vpow2.f32 %v545_v50 }
 0x234   : > { %v611_v51 = vpop.xlane.xlu2 %610 }
 0x235   : > { %v612_v52 = vsub.f32 %v608_v39, %v611_v51 }
 0x237   : > { %v613_v53 = vmul.f32 1.442695, %v612_v52 }
 0x238   : > { %v1050_v54 = vpop.eup %1049 }
 0x239   : > { %1051 = vpow2.f32 %v613_v53  ;;  %v547_v55 = vsel %vm448_vm1, %v1050_v54, 0.0 }
 0x23a   : > { %548 = vadd.xlane.f32.xlu1 %v547_v55 }
 0x23c   : > { %v678_v56 = vpop.xlane.xlu2 %677  ;;  %v485_v57 = vpop.xlane.xlu0 %484 }
 0x23d   : > { %v679_v58 = vsub.f32 %v675_v42, %v678_v56  ;;  %1053 = vrcp.f32 %v485_v57 }
 0x23f   : > { %v1052_v59 = vpop.eup %1051  ;;  %v680_v60 = vmul.f32 1.442695, %v679_v58 }
 0x240   : > { %v615_v61 = vsel %vm448_vm1, %v1052_v59, 0.0 }
 0x241   : > { %1055 = vpow2.f32 %v680_v60  ;;  %616 = vadd.xlane.f32.xlu2 %v615_v61 }
 0x243   : > { %v1054_v62 = vpop.eup %1053 }
 0x244   : > { %v487_v63 = vmul.f32 %v1054_v62, %v1048_v43 }
 0x246   : > { %920 = vmatmul.msk.f32.vlgmr.msrb.gmra.mxu3 %vm448_vm1, %v487_v63 }
 0x247   : > { %v1056_v0 = vpop.eup %1055 }
 0x248   : > { %v682_v1 = vsel %vm448_vm1, %v1056_v0, 0.0 }
 0x249   : > { %683 = vadd.xlane.f32.xlu0 %v682_v1 }
 0x253   : > { %553 = vrot.lane.b32.xlu1 %v440_v47, %s1312_s8 }
 0x259   : > { %620 = vrot.lane.b32.xlu2 %v440_v47, %s1313_s11  ;;  %s778_s11 = sshll.u32 %s774_s18, 4  ;;  %s779_s11 = int_to_ptr.hbm [resolvable:$true] %s778_s11 }
 0x25d   : > { %687 = vrot.lane.b32.xlu0 %v440_v47, %s1311_s28  ;;  %s348_s28 = scalar_lea.vmem [#allocation13], %s909_s7  ;;  %s1233_s7 = scalar_lea.hbm %s1572_s6, 16 }
 0x25e   : > { %s776_s8 = sshll.u32 %s348_s28, 4  ;;  %s777_s8 = int_to_ptr.vmem [resolvable:$true] %s776_s8 }
 0x2ad   : > { %v549_v3 = vpop.xlane.xlu1 %548 }
 0x2b4   : > { %v617_v2 = vpop.xlane.xlu2 %616 }
 0x2b5   : > { %1057 = vrcp.f32 %v617_v2 }
 0x2b6   : > { %1059 = vrcp.f32 %v549_v3 }
 0x2bb   : > { %v1058_v4 = vpop.eup %1057 }
 0x2bc   : > { %v619_v5 = vmul.f32 %v1058_v4, %v1052_v59  ;;  %v621_v6 = vpop.permute.xlu2 %620  ;;  %v1060_v7 = vpop.eup %1059 }
 0x2bd   : > { %641 = vmatpush.msra.mxu3 %v621_v6  ;;  %v684_v8 = vpop.xlane.xlu0 %683  ;;  %v551_v10 = vmul.f32 %v1060_v7, %v1050_v54 }
 0x2be   : > { %926 = vmatmul.msk.f32.vlgmr.msra.gmra.mxu3 %vm448_vm1, %v619_v5  ;;  %1061 = vrcp.f32 %v684_v8 }
 0x2c4   : > { %v1062_v11 = vpop.eup %1061 }
 0x2c5   : > { %v554_v9 = vpop.permute.xlu1 %553  ;;  %v686_v12 = vmul.f32 %v1062_v11, %v1056_v0 }
 0x2c6   : > { %574 = vmatpush.msrb.mxu1 %v554_v9 }
 0x2c7   : > { %923 = vmatmul.msk.f32.vlgmr.msrb.gmra.mxu1 %vm448_vm1, %v551_v10 }
 0x2c9   : > { %v508_v14 = vpop.f32.mrf.mxu3 }
 0x2cf   : > { %v688_v13 = vpop.permute.xlu0 %687 }
 0x2d0   : > { %708 = vmatpush.msra.mxu1 %v688_v13 }
 0x2d1   : > { %929 = vmatmul.msk.f32.vlgmr.msra.gmra.mxu1 %vm448_vm1, %v686_v12 }
 0x341   : > { %v643_v15 = vpop.f32.mrf.mxu3 }
 0x342   : > { %718 = vrot.lane.b32.xlu0 %v643_v15, %s1314_s30  ;;  %s1227_s30 = sshra.s32 %s779_s11, 4  ;;  %s1228_s30 = int_to_ptr.hbm [resolvable:$true] %s1227_s30 }
 0x343   : > { %p1234_p9 = scmp.lt.s32.totalorder %s1228_s30, %s1572_s6 }
 0x344   : > { %v576_v16 = vpop.f32.mrf.mxu1 }
 0x345   : > { %714 = vrot.lane.b32.xlu1 %v576_v16, %s1315_s10  ;;  %s1229_s10 = scalar_lea.hbm %s1228_s30, 8 }
 0x346   : > { %p1230_p1 = scmp.ne.s32.totalorder %s1228_s30, %s1229_s10  ;;  %p1235_p10 = scmp.lt.s32.totalorder %s1233_s7, %s1229_s10 }
 0x348   : > { %p1231_p3 = pnand %p1230_p1, %p1444_p0  ;;  %p1236_p12 = por %p1235_p10, %p1234_p9 }
 0x34a   : > { %p1232_p8 = pneg %p1231_p3 }
 0x34c   : > { %p1237_p13 = pnand %p1236_p12, %p1232_p8 }
 0x34e   : > { %v710_v17 = vpop.f32.mrf.mxu1 }
 0x34f   : > { %722 = vrot.lane.b32.xlu2 %v710_v17, %s1316_s12 }
 0x3a9   : > { %v723_v25 = vpop.permute.xlu2 %722 }
 0x3b4   : > { %v719_v23 = vpop.permute.xlu0 %718 }
 0x3b7   : > { %v715_v22 = vpop.permute.xlu1 %714 }
 0x3b8   : > { %v725_v24 = vsel %vm448_vm1, %v508_v14, %v715_v22 }
 0x3b9   : > { %v727_v26 = vsel %vm726_vm3, %v725_v24, %v719_v23 }
 0x3ba   : > { %v729_v27 = vsel %vm728_vm4, %v727_v26, %v723_v25 }
 0x3bb   : > { %930 = vmatmul.msk.f32.vlgmr.msra.gmra.mxu2 %vm358_vm0, %v729_v27 }
 0x43e   : > { %v758_v29 = vpop.f32.mrf.mxu2 }
 0x43f   : > { %v759_v30 = vadd.f32 %v1046_v28, %v758_v29 }
 0x441   : > { %761 = vst.msk [vmem:[%s348_s28] sm:$0xff] %vm358_vm0, %v759_v30 }
 0x442   : > { %1240 = shalt.err (!%p1237_p13)
}
 0x443   : > { %953 = dma.vmem_to_hbm [thread:$0]  (%p1444_p0), %s777_s8, 128, %s779_s11, %s763_s24  }
 0x444 PF: > { %s790_s19 = sand.u32 1, %s1283_s21   ;;  %p973_p2 = pnand %p905_p6, %p1451_p5 }
 0x445   : > { %s791_s18 = scalar_lea.sflag [#allocation6], %s790_s19 }
 0x446   : > { %p974_p4 = pneg %p973_p2 }
 0x448   : > { %1278 = dma.done.wait (%p974_p4), %s791_s18, 128  }
 0x449   : > { %1280 = vsyncadd (%p974_p4), %s791_s18, 4294967168  ;;  %s24_s26 = sadd.s32 1, %s1303_s26   ;;  %s1579_s21 = smov %s1287_s22 }
 0x44a   : > { %p21_p7 = scmp.ge.s32.totalorder %s24_s26, 4   ;;  %s1580_s22 = smov %s1291_s23 }
 0x44b   : > { %s1581_s23 = smov %s1449_s16  ;;  %s1582_s24 = smov %s1299_s25 }
 0x44c   : > { %s1583_s25 = smov %s1585_s14  ;;  %23 = sbr.rel (!%p21_p7) target bundleno = 8 (0x8), region = 110 }
 0x451   :  { %797 = vsyncpa [#allocation5], 1 }
 0x452   :  { %799 = vsyncpa [#allocation5 + $0x1], 1 }
 0x453   :  { %800 = vsyncpa [#allocation8], 1 }
 0x454   :  { %801 = vsyncpa [#allocation11], 1 }
 0x455   :  { %802 = vsyncpa [#allocation6], 1 }
 0x456   :  { %804 = vsyncpa [#allocation6 + $0x1], 1 }

</bundles_post_ra>
